<compile_context>
chip_gen: v7x
topology: tpu7x:2x2x1
jax: 0.10.0
libtpu: 0.0.40
codegen_flags: <defaults>
</compile_context>

<pallas_src>
import functools

import numpy as np

import jax
import jax.numpy as jnp
from jax.experimental import pallas as pl
from jax.experimental.pallas import tpu as pltpu


# ----------------------------------------------------------------------------
# Kernel bodies
# ----------------------------------------------------------------------------
def _cam_gate(x, w1t_ref, rest_ref, *, Cr, Bt):
    """Channel-attention gate for a (Bt, C, HW) f32 tile -> (Bt, C) gate.

    w1t_ref : (C, Cr)     W1^T  (hidden dim zero-padded to Cr)
    rest_ref: (Cr+2, C)   rows [0:Cr]=W2^T, row Cr = b2, row Cr+1 = b1 (padded)
    """
    HW = x.shape[2]
    mx_c = jnp.max(x, axis=2)                                # (Bt, C)
    av_c = jnp.sum(x, axis=2) * (1.0 / HW)                   # (Bt, C)
    pooled = jnp.concatenate([mx_c, av_c], axis=0)           # (2Bt, C)

    w1t = w1t_ref[...]                                       # (C, Cr)
    rest = rest_ref[...]                                     # (Cr+2, C)
    w2t = rest[0:Cr, :]                                      # (Cr, C)
    b2 = rest[Cr:Cr + 1, :]                                  # (1, C)
    b1 = rest[Cr + 1:Cr + 2, 0:Cr]                           # (1, Cr)

    # Tiny MXU dots (max & avg paths share them via the stacked pooled tile).
    h = jnp.maximum(
        jnp.dot(pooled, w1t, preferred_element_type=jnp.float32) + b1, 0.0)
    out = jnp.dot(h, w2t, preferred_element_type=jnp.float32) + b2   # (2Bt, C)
    return jax.nn.sigmoid(out[0:Bt, :] + out[Bt:2 * Bt, :])  # (Bt, C)


def _cbam_kernel_matmul(x_ref, w1t_ref, rest_ref, convmat_ref, o_ref, *, Cr, Bt):
    """Fused CBAM; spatial 7x7 conv realized as one MXU matmul (small HW)."""
    x = x_ref[...].astype(jnp.float32)                       # (Bt, C, HW)
    C = x.shape[1]

    gate_c = _cam_gate(x, w1t_ref, rest_ref, Cr=Cr, Bt=Bt)   # (Bt, C)
    xc = x * gate_c[:, :, None]                              # (Bt, C, HW)

    mx_s = jnp.max(xc, axis=1)                               # (Bt, HW)
    av_s = jnp.sum(xc, axis=1) * (1.0 / C)                   # (Bt, HW)
    pooled = jnp.concatenate([mx_s, av_s], axis=1)           # (Bt, 2*HW)

    # Zero-padded 7x7 conv == matmul against the precomputed (2*HW, HW) matrix.
    pre = jnp.dot(pooled, convmat_ref[...],
                  preferred_element_type=jnp.float32)        # (Bt, HW)
    gate_s = jax.nn.sigmoid(pre)

    o_ref[...] = (gate_s[:, None, :] * xc + x).astype(o_ref.dtype)


def _cbam_kernel_roll(x_ref, w1t_ref, rest_ref, wmask_ref, o_ref,
                      *, Cr, Bt, H, W, K):
    """Fused CBAM; spatial conv via K*K lane-rolls on a packed (2*Bt, HW) tile."""
    HW = H * W
    R = K // 2
    x = x_ref[...].astype(jnp.float32)                       # (Bt, C, HW)
    C = x.shape[1]

    gate_c = _cam_gate(x, w1t_ref, rest_ref, Cr=Cr, Bt=Bt)   # (Bt, C)
    xc = x * gate_c[:, :, None]

    mx_s = jnp.max(xc, axis=1)                               # (Bt, HW)
    av_s = jnp.sum(xc, axis=1) * (1.0 / C)                   # (Bt, HW)
    # max rows first, avg rows second -> matches wmask row layout.
    pooled = jnp.concatenate([mx_s, av_s], axis=0)           # (2*Bt, HW)

    acc = jnp.zeros((2 * Bt, HW), jnp.float32)
    for t in range(K * K):
        off = (t // K - R) * W + (t % K - R)
        shift = (-off) % HW
        rolled = pltpu.roll(pooled, shift=shift, axis=1) if shift else pooled
        # wmask[t] already carries conv-weight * in-bounds-mask per row.
        acc = acc + wmask_ref[t] * rolled
    pre = acc[0:Bt, :] + acc[Bt:2 * Bt, :]                   # (Bt, HW)
    gate_s = jax.nn.sigmoid(pre)

    o_ref[...] = (gate_s[:, None, :] * xc + x).astype(o_ref.dtype)


# ----------------------------------------------------------------------------
# Wrapper / precompute
# ----------------------------------------------------------------------------
def _tap_masks(H, W, K):
    """numpy (K*K, H*W) float32: 1 where the conv tap (dy,dx) is in-bounds."""
    R = K // 2
    pos = np.arange(H * W)
    rr, cc = pos // W, pos % W
    masks = []
    for dy in range(K):
        for dx in range(K):
            oy, ox = dy - R, dx - R
            m = (rr + oy >= 0) & (rr + oy < H) & (cc + ox >= 0) & (cc + ox < W)
            masks.append(m)
    return np.stack(masks).astype(np.float32)


def _pick_batch_tile(B, max_tile=8):
    """Largest divisor of B (<= max_tile) that keeps grid >= 2 when possible."""
    divisors = [d for d in range(1, min(B, max_tile) + 1) if B % d == 0]
    multi = [d for d in divisors if B // d >= 2]
    return max(multi) if multi else max(divisors)


def make_cbam(params, *, batch, channels, height, width, conv_method="auto",
              conv_matrix_max_bytes=4 * 1024 * 1024, max_batch_tile=8):
    """Build a jitted CBAM forward for fixed shapes; precomputes all
    weight-derived kernel operands once."""
    B, C, H, W = batch, channels, height, width
    HW = H * W
    K = int(params["sam_w"].shape[-1])
    KK = K * K
    R = K // 2
    Cr = int(params["cam_w1"].shape[0])
    Crp = ((Cr + 7) // 8) * 8          # zero-pad hidden dim for friendly tiles

    assert C % 8 == 0 and HW % 128 == 0, "C must be x8 and H*W x128"
    # TODO(synk): shapes violating the (8,128) tiling would need wrapper padding.

    Bt = _pick_batch_tile(B, max_batch_tile)
    steps = B // Bt
    f32 = jnp.float32

    # Packed CAM parameters (2 operands, no in-kernel transposes).
    w1t = jnp.zeros((C, Crp), f32).at[:, :Cr].set(
        jnp.asarray(params["cam_w1"], f32).T)                         # (C, Crp)
    rest = jnp.zeros((Crp + 2, C), f32)
    rest = rest.at[0:Cr, :].set(jnp.asarray(params["cam_w2"], f32).T)  # W2^T
    rest = rest.at[Crp, :].set(jnp.asarray(params["cam_b2"], f32))     # b2
    rest = rest.at[Crp + 1, 0:Cr].set(jnp.asarray(params["cam_b1"], f32))  # b1
    sam_w = jnp.asarray(params["sam_w"], f32)                          # (1,2,K,K)

    if conv_method == "auto":
        conv_method = ("matmul" if 2 * HW * HW * 4 <= conv_matrix_max_bytes
                       else "roll")

    if conv_method == "matmul":
        # (2*HW, HW) masked conv matrix: row q = zero-padded 7x7 conv response
        # of a one-hot input image (channel q//HW, pixel q%HW).  Built once.
        eye2 = jnp.eye(2 * HW, dtype=f32).reshape(2 * HW, 2, H, W)
        convmat = jax.lax.conv_general_dilated(
            eye2, sam_w, window_strides=(1, 1), padding=((R, R), (R, R)),
            dimension_numbers=("NCHW", "OIHW", "NCHW")).reshape(2 * HW, HW)
        conv_operand = convmat
        conv_spec = pl.BlockSpec((2 * HW, HW), lambda g: (0, 0))
        kernel = functools.partial(_cbam_kernel_matmul, Cr=Crp, Bt=Bt)
    else:
        # Roll path: conv weights folded into the in-bounds masks, replicated
        # over the (max rows | avg rows) x batch sublane layout.
        mask = _tap_masks(H, W, K)                                     # (KK, HW)
        w2ch = sam_w.reshape(2, KK)                                    # [max; avg]
        wm = jnp.asarray(mask)[:, None, :] * jnp.transpose(w2ch)[:, :, None]
        wmask = jnp.broadcast_to(wm[:, :, None, :],
                                 (KK, 2, Bt, HW)).reshape(KK, 2 * Bt, HW)
        conv_operand = wmask
        conv_spec = pl.BlockSpec((KK, 2 * Bt, HW), lambda g: (0, 0, 0))
        kernel = functools.partial(_cbam_kernel_roll, Cr=Crp, Bt=Bt,
                                   H=H, W=W, K=K)

    pallas_fn = pl.pallas_call(
        kernel,
        out_shape=jax.ShapeDtypeStruct((B, C, HW), jnp.float32),
        grid_spec=pltpu.PrefetchScalarGridSpec(
            num_scalar_prefetch=0,
            grid=(steps,),
            in_specs=[
                pl.BlockSpec((Bt, C, HW), lambda g: (g, 0, 0)),   # x
                pl.BlockSpec((C, Crp), lambda g: (0, 0)),         # W1^T (padded)
                pl.BlockSpec((Crp + 2, C), lambda g: (0, 0)),     # W2^T | b2 | b1
                conv_spec,                                        # conv operand
            ],
            out_specs=pl.BlockSpec((Bt, C, HW), lambda g: (g, 0, 0)),
        ),
        compiler_params=pltpu.CompilerParams(
            dimension_semantics=("parallel",)),
    )

    @jax.jit
    def _forward(x, w1t_, rest_, conv_):
        xf = x.reshape(B, C, HW)
        out = pallas_fn(xf, w1t_, rest_, conv_)
        return out.reshape(B, C, H, W).astype(x.dtype)

    def forward(x):
        return _forward(x, w1t, rest, conv_operand)

    return forward


# ----------------------------------------------------------------------------
# Pure-JAX reference (matches the PyTorch CBAM.forward, inference)
# ----------------------------------------------------------------------------
def cbam_reference(x, params):
    K = params["sam_w"].shape[-1]
    R = K // 2

    def mlp(v):
        h = jax.nn.relu(v @ params["cam_w1"].T + params["cam_b1"])
        return h @ params["cam_w2"].T + params["cam_b2"]

    mx = jnp.max(x, axis=(2, 3))
    av = jnp.mean(x, axis=(2, 3))
    gate_c = jax.nn.sigmoid(mlp(mx) + mlp(av))[:, :, None, None]
    xc = gate_c * x

    mx_s = jnp.max(xc, axis=1, keepdims=True)
    av_s = jnp.mean(xc, axis=1, keepdims=True)
    cc = jnp.concatenate([mx_s, av_s], axis=1)
    pre = jax.lax.conv_general_dilated(
        cc, params["sam_w"], window_strides=(1, 1), padding=((R, R), (R, R)),
        dimension_numbers=("NCHW", "OIHW", "NCHW"))
    return jax.nn.sigmoid(pre) * xc + x


# ----------------------------------------------------------------------------
if __name__ == "__main__":
    key = jax.random.PRNGKey(0)
    kx, k1, k2, k3, k4, k5 = jax.random.split(key, 6)

    # CBAM(channels=64, r=16) on 16x16 feature maps, batch 2.
    B, C, H, W, r = 2, 64, 16, 16, 16
    Cr = C // r
    x = jax.random.normal(kx, (B, C, H, W), dtype=jnp.float32)
    params = {
        "cam_w1": (0.1 * jax.random.normal(k1, (Cr, C))).astype(jnp.float32),
        "cam_b1": (0.05 * jax.random.normal(k2, (Cr,))).astype(jnp.float32),
        "cam_w2": (0.1 * jax.random.normal(k3, (C, Cr))).astype(jnp.float32),
        "cam_b2": (0.05 * jax.random.normal(k4, (C,))).astype(jnp.float32),
        "sam_w": (0.1 * jax.random.normal(k5, (1, 2, 7, 7))).astype(jnp.float32),
    }

    ref = jax.block_until_ready(cbam_reference(x, params))

    # Default (small-HW) path: conv as one MXU matmul.
    fwd = make_cbam(params, batch=B, channels=C, height=H, width=W)
    out = jax.block_until_ready(fwd(x))
    assert out.shape == (B, C, H, W), out.shape
    assert bool(jnp.all(jnp.isfinite(out)))
    err = float(jnp.max(jnp.abs(out - ref)))
    assert err < 2e-3, f"matmul-path max abs error vs reference: {err}"

    # Fallback (large-HW) path: packed-sublane roll loop with weighted masks.
    fwd_roll = make_cbam(params, batch=B, channels=C, height=H, width=W,
                         conv_method="roll")
    out_r = jax.block_until_ready(fwd_roll(x))
    err_r = float(jnp.max(jnp.abs(out_r - ref)))
    assert err_r < 2e-3, f"roll-path max abs error vs reference: {err_r}"

    print("KERNEL_OK")
</pallas_src>

<mosaic_0001>
module attributes {stable_mosaic.version = 11 : i64} {
  func.func @_cbam_kernel_matmul(%arg0: i32, %arg1: memref<1x64x256xf32, #tpu.memory_space<vmem>>, %arg2: memref<64x8xf32, #tpu.memory_space<vmem>>, %arg3: memref<10x64xf32, #tpu.memory_space<vmem>>, %arg4: memref<512x256xf32, #tpu.memory_space<vmem>>, %arg5: memref<1x64x256xf32, #tpu.memory_space<vmem>>) attributes {dimension_semantics = [#tpu.dimension_semantics<parallel>], iteration_bounds = array<i64: 2>, scalar_prefetch = 0 : i64, scratch_operands = 0 : i64, tpu.core_type = #tpu.core_type<tc>, window_params = [{transform_indices = @transform_0, window_bounds = array<i64: 1, 64, 256>}, {pipeline_mode = #tpu.pipeline_mode<synchronous>, transform_indices = @transform_1, window_bounds = array<i64: 64, 8>}, {pipeline_mode = #tpu.pipeline_mode<synchronous>, transform_indices = @transform_2, window_bounds = array<i64: 10, 64>}, {pipeline_mode = #tpu.pipeline_mode<synchronous>, transform_indices = @transform_3, window_bounds = array<i64: 512, 256>}, {transform_indices = @transform_4, window_bounds = array<i64: 1, 64, 256>}]} {
    %c0 = arith.constant 0 : index
    %c0_0 = arith.constant 0 : index
    %c0_1 = arith.constant 0 : index
    %0 = vector.load %arg1[%c0, %c0_0, %c0_1] : memref<1x64x256xf32, #tpu.memory_space<vmem>>, vector<1x64x256xf32>
    %cst = arith.constant dense<0xFF800000> : vector<1x64xf32>
    %1 = vector.multi_reduction <maximumf>, %0, %cst [2] : vector<1x64x256xf32> to vector<1x64xf32>
    %cst_2 = arith.constant dense<0.000000e+00> : vector<1x64xf32>
    %2 = vector.multi_reduction <add>, %0, %cst_2 [2] : vector<1x64x256xf32> to vector<1x64xf32>
    %cst_3 = arith.constant 3.906250e-03 : f32
    %3 = vector.broadcast %cst_3 : f32 to vector<1x64xf32>
    %4 = arith.mulf %2, %3 : vector<1x64xf32>
    %5 = tpu.concatenate %1, %4 in 0 : vector<1x64xf32>, vector<1x64xf32> -> vector<2x64xf32>
    %c0_4 = arith.constant 0 : index
    %c0_5 = arith.constant 0 : index
    %6 = vector.load %arg2[%c0_4, %c0_5] : memref<64x8xf32, #tpu.memory_space<vmem>>, vector<64x8xf32>
    %c0_6 = arith.constant 0 : index
    %c0_7 = arith.constant 0 : index
    %7 = vector.load %arg3[%c0_6, %c0_7] : memref<10x64xf32, #tpu.memory_space<vmem>>, vector<10x64xf32>
    %8 = vector.extract_strided_slice %7 {offsets = [0, 0], sizes = [8, 64], strides = [1, 1]} : vector<10x64xf32> to vector<8x64xf32>
    %9 = vector.extract_strided_slice %7 {offsets = [8, 0], sizes = [1, 64], strides = [1, 1]} : vector<10x64xf32> to vector<1x64xf32>
    %10 = vector.extract_strided_slice %7 {offsets = [9, 0], sizes = [1, 8], strides = [1, 1]} : vector<10x64xf32> to vector<1x8xf32>
    %cst_8 = arith.constant dense<0.000000e+00> : vector<2x8xf32>
    %11 = tpu.matmul %5, %6, %cst_8 {dimension_numbers = #tpu.dot_dimension_numbers<[1], [0], [0], [1], [0, 0, 1, 1], [], []>} : vector<2x64xf32>, vector<64x8xf32>, vector<2x8xf32> -> vector<2x8xf32>
    %12 = vector.broadcast %10 : vector<1x8xf32> to vector<2x8xf32>
    %13 = arith.addf %11, %12 : vector<2x8xf32>
    %cst_9 = arith.constant 0.000000e+00 : f32
    %14 = vector.broadcast %cst_9 : f32 to vector<2x8xf32>
    %15 = arith.maximumf %13, %14 : vector<2x8xf32>
    %cst_10 = arith.constant dense<0.000000e+00> : vector<2x64xf32>
    %16 = tpu.matmul %15, %8, %cst_10 {dimension_numbers = #tpu.dot_dimension_numbers<[1], [0], [0], [1], [0, 0, 1, 1], [], []>} : vector<2x8xf32>, vector<8x64xf32>, vector<2x64xf32> -> vector<2x64xf32>
    %17 = vector.broadcast %9 : vector<1x64xf32> to vector<2x64xf32>
    %18 = arith.addf %16, %17 : vector<2x64xf32>
    %19 = vector.extract_strided_slice %18 {offsets = [0, 0], sizes = [1, 64], strides = [1, 1]} : vector<2x64xf32> to vector<1x64xf32>
    %20 = vector.extract_strided_slice %18 {offsets = [1, 0], sizes = [1, 64], strides = [1, 1]} : vector<2x64xf32> to vector<1x64xf32>
    %21 = arith.addf %19, %20 : vector<1x64xf32>
    %22 = arith.negf %21 : vector<1x64xf32>
    %23 = math.exp %22 : vector<1x64xf32>
    %cst_11 = arith.constant 1.000000e+00 : f32
    %24 = vector.broadcast %cst_11 : f32 to vector<1x64xf32>
    %25 = arith.addf %24, %23 : vector<1x64xf32>
    %26 = arith.divf %24, %25 : vector<1x64xf32>
    %27 = vector.shape_cast %26 : vector<1x64xf32> to vector<1x64x1xf32>
    %28 = vector.broadcast %27 : vector<1x64x1xf32> to vector<1x64x256xf32>
    %29 = arith.mulf %0, %28 : vector<1x64x256xf32>
    %cst_12 = arith.constant dense<0xFF800000> : vector<1x256xf32>
    %30 = vector.multi_reduction <maximumf>, %29, %cst_12 [1] : vector<1x64x256xf32> to vector<1x256xf32>
    %cst_13 = arith.constant dense<0.000000e+00> : vector<1x256xf32>
    %31 = vector.multi_reduction <add>, %29, %cst_13 [1] : vector<1x64x256xf32> to vector<1x256xf32>
    %cst_14 = arith.constant 1.562500e-02 : f32
    %32 = vector.broadcast %cst_14 : f32 to vector<1x256xf32>
    %33 = arith.mulf %31, %32 : vector<1x256xf32>
    %34 = tpu.concatenate %30, %33 in 1 : vector<1x256xf32>, vector<1x256xf32> -> vector<1x512xf32>
    %c0_15 = arith.constant 0 : index
    %c0_16 = arith.constant 0 : index
    %35 = vector.load %arg4[%c0_15, %c0_16] : memref<512x256xf32, #tpu.memory_space<vmem>>, vector<512x256xf32>
    %cst_17 = arith.constant dense<0.000000e+00> : vector<1x256xf32>
    %36 = tpu.matmul %34, %35, %cst_17 {dimension_numbers = #tpu.dot_dimension_numbers<[1], [0], [0], [1], [0, 0, 1, 1], [], []>} : vector<1x512xf32>, vector<512x256xf32>, vector<1x256xf32> -> vector<1x256xf32>
    %37 = arith.negf %36 : vector<1x256xf32>
    %38 = math.exp %37 : vector<1x256xf32>
    %cst_18 = arith.constant 1.000000e+00 : f32
    %39 = vector.broadcast %cst_18 : f32 to vector<1x256xf32>
    %40 = arith.addf %39, %38 : vector<1x256xf32>
    %41 = arith.divf %39, %40 : vector<1x256xf32>
    %42 = vector.shape_cast %41 : vector<1x256xf32> to vector<1x1x256xf32>
    %43 = vector.broadcast %42 : vector<1x1x256xf32> to vector<1x64x256xf32>
    %44 = arith.mulf %43, %29 : vector<1x64x256xf32>
    %45 = arith.addf %44, %0 : vector<1x64x256xf32>
    %c0_19 = arith.constant 0 : index
    %c0_20 = arith.constant 0 : index
    %c0_21 = arith.constant 0 : index
    %46 = vector.load %arg5[%c0_19, %c0_20, %c0_21] : memref<1x64x256xf32, #tpu.memory_space<vmem>>, vector<1x64x256xf32>
    tpu.vector_store %arg5[%c0_19, %c0_20, %c0_21], %45 {strides = array<i32>} : memref<1x64x256xf32, #tpu.memory_space<vmem>>, vector<1x64x256xf32>,
    return
  }
  func.func @transform_0(%arg0: i32) -> (i32, i32, i32) {
    %c0_i32 = arith.constant 0 : i32
    %c0_i32_0 = arith.constant 0 : i32
    %c0_i32_1 = arith.constant 0 : i32
    return %arg0, %c0_i32, %c0_i32_0 : i32, i32, i32
  }
  func.func @transform_1(%arg0: i32) -> (i32, i32) {
    %c0_i32 = arith.constant 0 : i32
    %c0_i32_0 = arith.constant 0 : i32
    %c0_i32_1 = arith.constant 0 : i32
    return %c0_i32, %c0_i32_0 : i32, i32
  }
  func.func @transform_2(%arg0: i32) -> (i32, i32) {
    %c0_i32 = arith.constant 0 : i32
    %c0_i32_0 = arith.constant 0 : i32
    %c0_i32_1 = arith.constant 0 : i32
    return %c0_i32, %c0_i32_0 : i32, i32
  }
  func.func @transform_3(%arg0: i32) -> (i32, i32) {
    %c0_i32 = arith.constant 0 : i32
    %c0_i32_0 = arith.constant 0 : i32
    %c0_i32_1 = arith.constant 0 : i32
    return %c0_i32, %c0_i32_0 : i32, i32
  }
  func.func @transform_4(%arg0: i32) -> (i32, i32, i32) {
    %c0_i32 = arith.constant 0 : i32
    %c0_i32_0 = arith.constant 0 : i32
    %c0_i32_1 = arith.constant 0 : i32
    return %arg0, %c0_i32, %c0_i32_0 : i32, i32, i32
  }
}

</mosaic_0001>

<bundles_post_ra>
// kernel: _forward.1
= control target key start
LH: loop header
LB: loop body
LE: loop exit
PB: predicated region body
PF: predicated region fallthrough
CT: control target
= control target key end

     0   :  { %9 = vsyncpa [#allocation3], 0  ;;  %s1406_s15 = smov 0   ;;  %s1755_s0 = inlined_call_operand.vmem [shape: f32[2,64,256], index: 0, kind: input, shape index: {}]   ;;  %s1756_s1 = inlined_call_operand.vmem [shape: f32[64,8], index: 1, kind: input, shape index: {}]   ;;  %s1757_s2 = inlined_call_operand.vmem [shape: f32[10,64], index: 2, kind: input, shape index: {}]   ;;  %s1758_s3 = inlined_call_operand.hbm [shape: f32[512,256], index: 3, kind: input, shape index: {}]   ;;  %s1759_s4 = inlined_call_operand.vmem [shape: f32[2,64,256], index: 4, kind: output, shape index: {}]  }
   0x1 LB: > { %s1412_s16 = sadd.s32 4294967295, %s1373_s15   ;;  %p1088_p0 = scmp.ge.s32.totalorder %s1373_s15, 1  ;;  %s1373_s15 = sphi %s1406_s15, %s15_s15  }
   0x2   : > { %p135_p1 = scmp.lt.s32.totalorder %s1373_s15, 3  ;;  %s1375_s17 = smov [#allocation2]  }
   0x3   : > { %s153_s18 = sshll.u32 %s1375_s17, 4  ;;  %p1760_p3 = scmp.eq.s32.totalorder %s1412_s16, 0  ;;  %s154_s18 = int_to_ptr.vmem [resolvable:$true] %s153_s18 }
   0x4   : > { %p1416_p2 = pnand %p1088_p0, %p135_p1  ;;  %s1335_s23 = scalar_lea.hbm %s1758_s3, 16384 }
   0x5   : > { %p1336_p6 = scmp.ne.s32.totalorder %s1758_s3, %s1335_s23  ;;  %p1342_p10 = scmp.lt.u32.totalorder %s1335_s23, %s1758_s3 }
   0x6   : > { %s1762_s19 = scalar_select %p1416_p2, 1, 0 }
   0x7   : > { %p1287_p4 = pneg %p1416_p2 }
   0x9   : > { %p1425_p5 = pnand %p1760_p3, %p1287_p4 }
   0xb   : > { %p1337_p7 = pneg %p1425_p5 }
   0xd   : > { %p1338_p8 = pnand %p1337_p7, %p1336_p6 }
   0xf   : > { %p1339_p9 = pneg %p1338_p8 }
  0x11   : > { %p1344_p11 = pnand %p1342_p10, %p1339_p9 }
  0x13   : > { %1347 = shalt.err (!%p1344_p11)
}
  0x14   : > { %s1348_s28 = scalar_lea.vmem %s154_s18, 16384  ;;  %p1356_p1 = scmp.lt.s32.totalorder %s154_s18, %s154_s18 }
  0x15   : > { %p1349_p12 = scmp.ne.s32.totalorder %s154_s18, %s1348_s28  ;;  %p1357_p4 = scmp.lt.s32.totalorder %s1348_s28, %s1348_s28 }
  0x17   : > { %p1351_p13 = pnand %p1349_p12, %p1337_p7  ;;  %p1358_p3 = por %p1357_p4, %p1356_p1 }
  0x19   : > { %p1352_p0 = pneg %p1351_p13 }
  0x1b   : > { %p1359_p2 = pnand %p1358_p3, %p1352_p0 }
  0x1d   : > { %1362 = shalt.err (!%p1359_p2)
}
  0x1e   : > { %s1376_s29 = smov 256   ;;  %s1377_s30 = smov 16  }
  0x1f   : > { %1290 = dma.hbm_to_vmem [thread:$0]  (!%p1425_p5), %s1758_s3, 16384, %s154_s18, [#allocation3], %s1376_s29, %s1376_s29, %s1377_s30  }
  0x20   : > { %p1764_p6 = scmp.ne.s32.totalorder %s1762_s19, 0 }
  0x21   : > { %p1765_p8 = scmp.eq.s32.totalorder (!%p1764_p6), %s1412_s16, 0 }
  0x22   : > { %177 = sbr.rel (%p1764_p6) target bundleno = 1093 (0x445), region = 36 }
  0x29   : > { %1368 = dma.done.wait (%p1765_p8), [#allocation3], 16384   ;;  %p1766_p7 = pmov %p1765_p8 }
  0x2a   : > { %p203_p2 = scmp.lt.s32.totalorder %s1412_s16, 1  ;;  %v399_v32 = vld [vmem:[%s1756_s1] sm:$0xff]  ;;  %v400_v33 = vld [vmem:[%s1756_s1 + $0x8] sm:$0xff]  ;;  %v1378_v35 = vmov 0.0|0.0   ;;  %v401_v36 = vld [vmem:[%s1756_s1 + $0x10] sm:$0xff]  ;;  %vm1379_vm0 = vmmov 0   ;;  %v293_v50 = vlaneseq }
  0x2b   : > { %1370 = vsyncadd (%p1766_p7), [#allocation3], 4294950912  ;;  %v1142_v34 = vpack.c.bf16 %v400_v33, %v399_v32  ;;  %1141 = vmatprep.subr.bf16.mxu0 %v1378_v35  ;;  %v402_v37 = vld [vmem:[%s1756_s1 + $0x18] sm:$0xff]  ;;  %v403_v39 = vld [vmem:[%s1756_s1 + $0x20] sm:$0xff]  ;;  %v1380_v45 = vmov 0.0   ;;  %vm304_vm1 = vcmask 130112  }
  0x2c   : > { %s1768_s16 = smov (!%p203_p2, %s1412_s16), 1  ;;  %v1145_v38 = vpack.c.bf16 %v402_v37, %v401_v36  ;;  %v404_v40 = vld [vmem:[%s1756_s1 + $0x28] sm:$0xff]  ;;  %v405_v42 = vld [vmem:[%s1756_s1 + $0x30] sm:$0xff]  ;;  %v406_v43 = vld [vmem:[%s1756_s1 + $0x38] sm:$0xff]  ;;  %1133 = vmatprep.mubr.msk.f32.mxu0 %vm1379_vm0, %v1380_v45  ;;  %1136 = vmatprep.subr.mxu1 %v1380_v45  ;;  %v294_v53 = vand.u32 127, %v293_v50  ;;  %v1567_v57 = vshrl.u32 %v293_v50, 7 }
  0x2d   : > { %s1104_s7 = sshll.u32 %s1768_s16, 7  ;;  %1143 = vmatpush3.bf16.msra.mxu0 %v1142_v34  ;;  %v1148_v41 = vpack.c.bf16 %v404_v40, %v403_v39  ;;  %v1151_v44 = vpack.c.bf16 %v406_v43, %v405_v42  ;;  %1138 = vmatprep.mubr.msk.f32.mxu1 %vm1379_vm0, %v1380_v45  ;;  %vm311_vm2 = vcmask 195712   ;;  %vm318_vm3 = vcmask 261312  }
  0x2e   : > { %s1461_s10 = scalar_lea.vmem %s1755_s0, %s1104_s7  ;;  %1144 = vmatprep.subr.bf16.mxu0 %v1378_v35  ;;  %v299_v55 = vadd.s32 4294967288, %v294_v53  ;;  %v306_v58 = vadd.s32 4294967280, %v294_v53  ;;  %v313_v62 = vadd.s32 4294967272, %v294_v53  ;;  %vm325_vm4 = vcmask 326912   ;;  %s1706_s11 = scalar_lea.vmem %s1759_s4, %s1104_s7 }
  0x2f   : > { %v1464_v0 = vld [vmem:[%s1461_s10 + $0x20] sm:$0xff]  ;;  %v1467_v1 = vld [vmem:[%s1461_s10 + $0x28] sm:$0xff]  ;;  %v1478_v5 = vld [vmem:[%s1461_s10 + $0x10] sm:$0xff]  ;;  %vm332_vm5 = vcmask 392512   ;;  %vm339_vm6 = vcmask 458112   ;;  %vm346_vm7 = vcmask 523712  }
  0x30   : > { %v1470_v2 = vld [vmem:[%s1461_s10] sm:$0xff]  ;;  %v259_v3 = vadd.f32 %v1467_v1, %v1464_v0  ;;  %v1475_v4 = vld [vmem:[%s1461_s10 + $0x8] sm:$0xff]  ;;  %v1481_v6 = vld [vmem:[%s1461_s10 + $0x18] sm:$0xff]  ;;  %v235_v17 = vmax.f32 %v1464_v0, %v1467_v1  ;;  %v302_v60 = vsub.s32 %v299_v55, %v1567_v57  ;;  %vm397_vm8 = vcmask 1040384  }
  0x31   : > { %v253_v7 = vadd.f32 %v1475_v4, %v1470_v2  ;;  %v229_v8 = vmax.f32 %v1470_v2, %v1475_v4  ;;  %v256_v9 = vadd.f32 %v1481_v6, %v1478_v5  ;;  %v1490_v10 = vld [vmem:[%s1461_s10 + $0x30] sm:$0xff]  ;;  %v1493_v11 = vld [vmem:[%s1461_s10 + $0x38] sm:$0xff]  ;;  %v232_v13 = vmax.f32 %v1478_v5, %v1481_v6  ;;  %v1500_v14 = vld [vmem:[%s1461_s10 + $0x40] sm:$0xff]  ;;  %1146 = vmatpush3.bf16.msra.mxu0 %v1145_v38 }
  0x32   : > { %260 = vadd.xlane.f32.xlu1 %v259_v3  ;;  %v262_v12 = vadd.f32 %v1493_v11, %v1490_v10  ;;  %v1503_v15 = vld [vmem:[%s1461_s10 + $0x48] sm:$0xff]  ;;  %v1510_v18 = vld [vmem:[%s1461_s10 + $0x50] sm:$0xff]  ;;  %v1513_v19 = vld [vmem:[%s1461_s10 + $0x58] sm:$0xff]  ;;  %v238_v21 = vmax.f32 %v1490_v10, %v1493_v11  ;;  %1147 = vmatprep.subr.bf16.mxu0 %v1378_v35  ;;  %v320_v3 = vadd.s32 4294967264, %v294_v53  ;;  %vm413_vm9 = vcmask 523264  }
  0x33   : > { %254 = vadd.xlane.f32.xlu0 %v253_v7  ;;  %v265_v16 = vadd.f32 %v1503_v15, %v1500_v14  ;;  %v268_v20 = vadd.f32 %v1513_v19, %v1510_v18  ;;  %v1520_v22 = vld [vmem:[%s1461_s10 + $0x60] sm:$0xff]  ;;  %v1523_v23 = vld [vmem:[%s1461_s10 + $0x68] sm:$0xff]  ;;  %v241_v25 = vmax.f32 %v1500_v14, %v1503_v15  ;;  %v1530_v26 = vld [vmem:[%s1461_s10 + $0x70] sm:$0xff]  ;;  %v244_v29 = vmax.f32 %v1510_v18, %v1513_v19 }
  0x34   : > { %v271_v24 = vadd.f32 %v1523_v23, %v1520_v22  ;;  %v1533_v27 = vld [vmem:[%s1461_s10 + $0x78] sm:$0xff]  ;;  %v247_v31 = vmax.f32 %v1520_v22, %v1523_v23  ;;  %v327_v7 = vadd.s32 4294967256, %v294_v53  ;;  %vm492_vm10 = vcmask 64512  }
  0x35   : > { %v274_v28 = vadd.f32 %v1533_v27, %v1530_v26  ;;  %v250_v30 = vmax.f32 %v1530_v26, %v1533_v27  ;;  %1149 = vmatpush3.bf16.msra.mxu0 %v1148_v41 }
  0x36   : > { %230 = vmax.xlane.f32.xlu1 %v229_v8  ;;  %1150 = vmatprep.subr.bf16.mxu0 %v1378_v35  ;;  %v297_v8 = vsub.s32 %v294_v53, %v1567_v57 }
  0x37   : > { %257 = vadd.xlane.f32.xlu0 %v256_v9 }
  0x39   : > { %1152 = vmatpush3.bf16.msra.mxu0 %v1151_v44 }
  0x3a   : > { %263 = vadd.xlane.f32.xlu1 %v262_v12  ;;  %v334_v12 = vadd.s32 4294967248, %v294_v53 }
  0x3b   : > { %233 = vmax.xlane.f32.xlu0 %v232_v13  ;;  %v309_v13 = vsub.s32 %v306_v58, %v1567_v57 }
  0x3c   : > { %v337_v35 = vsub.s32 %v334_v12, %v1567_v57 }
  0x3e   : > { %266 = vadd.xlane.f32.xlu1 %v265_v16 }
  0x3f   : > { %236 = vmax.xlane.f32.xlu0 %v235_v17  ;;  %v341_v17 = vadd.s32 4294967240, %v294_v53 }
  0x41   : > { %v344_v39 = vsub.s32 %v341_v17, %v1567_v57 }
  0x42   : > { %269 = vadd.xlane.f32.xlu1 %v268_v20 }
  0x43   : > { %239 = vmax.xlane.f32.xlu0 %v238_v21  ;;  %v316_v21 = vsub.s32 %v313_v62, %v1567_v57 }
  0x46   : > { %272 = vadd.xlane.f32.xlu1 %v271_v24 }
  0x47   : > { %242 = vmax.xlane.f32.xlu0 %v241_v25 }
  0x4a   : > { %275 = vadd.xlane.f32.xlu1 %v274_v28 }
  0x4b   : > { %245 = vmax.xlane.f32.xlu0 %v244_v29  ;;  %v323_v29 = vsub.s32 %v320_v3, %v1567_v57 }
  0x4e   : > { %251 = vmax.xlane.f32.xlu1 %v250_v30 }
  0x4f   : > { %248 = vmax.xlane.f32.xlu0 %v247_v31  ;;  %v330_v31 = vsub.s32 %v327_v7, %v1567_v57 }
  0xbf   : > { %v261_v46 = vpop.xlane.xlu1 %260 }
  0xc0   : > { %v255_v47 = vpop.xlane.xlu0 %254  ;;  %v279_v28 = vmul.f32 0.00390625, %v261_v46 }
  0xc1   : > { %v277_v9 = vmul.f32 0.00390625, %v255_v47 }
  0xc2   : > { %v369_v46 = vrot.slane %v279_v28, %v309_v13 }
  0xc3   : > { %v231_v48 = vpop.xlane.xlu1 %230  ;;  %v360_v32 = vrot.slane %v277_v9, %v297_v8 }
  0xc4   : > { %v258_v49 = vpop.xlane.xlu0 %257  ;;  %v298_v36 = vrot.slane %v231_v48, %v297_v8 }
  0xc5   : > { %v278_v61 = vmul.f32 0.00390625, %v258_v49 }
  0xc7   : > { %v264_v51 = vpop.xlane.xlu1 %263  ;;  %v364_v20 = vrot.slane %v278_v61, %v302_v60 }
  0xc8   : > { %v234_v52 = vpop.xlane.xlu0 %233  ;;  %v280_v24 = vmul.f32 0.00390625, %v264_v51 }
  0xc9   : > { %v303_v33 = vrot.slane %v234_v52, %v302_v60  ;;  %v365_v41 = vsel %vm304_vm1, %v364_v20, %v360_v32  ;;  %v407_v20 = vld [vmem:[%s1757_s2] sm:$0xff]  ;;  %v682_v32 = vld [vmem:[#allocation2 + $0x8] sm:$0xff] }
  0xca   : > { %v374_v42 = vrot.slane %v280_v24, %v316_v21  ;;  %v370_v52 = vsel %vm311_vm2, %v369_v46, %v365_v41  ;;  %1137 = vmatpush3.msra.mxu1 %v407_v20  ;;  %v1596_v24 = vld [vmem:[%s1757_s2 + $0x8] sm:$0x3]  ;;  %v745_v41 = vld [vmem:[#allocation2 + $0x200] sm:$0xff] }
  0xcb   : > { %v267_v54 = vpop.xlane.xlu1 %266  ;;  %v305_v50 = vsel %vm304_vm1, %v303_v33, %v298_v36  ;;  %v684_v33 = vld [vmem:[#allocation2 + $0x18] sm:$0xff]  ;;  %v750_v46 = vld [vmem:[#allocation2 + $0x228] sm:$0xff] }
  0xcc   : > { %v237_v56 = vpop.xlane.xlu0 %236  ;;  %v281_v30 = vmul.f32 0.00390625, %v267_v54  ;;  %v748_v36 = vld [vmem:[#allocation2 + $0x218] sm:$0xff] }
  0xcd   : > { %v310_v37 = vrot.slane %v237_v56, %v309_v13  ;;  %v375_v56 = vsel %vm318_vm3, %v374_v42, %v370_v52  ;;  %v747_v42 = vld [vmem:[#allocation2 + $0x210] sm:$0xff]  ;;  %v749_v52 = vld [vmem:[#allocation2 + $0x220] sm:$0xff] }
  0xce   : > { %v379_v47 = vrot.slane %v281_v30, %v323_v29 }
  0xcf   : > { %v270_v59 = vpop.xlane.xlu1 %269  ;;  %v312_v53 = vsel %vm311_vm2, %v310_v37, %v305_v50  ;;  %v681_v37 = vld [vmem:[#allocation2] sm:$0xff] }
  0xd0   : > { %v240_v63 = vpop.xlane.xlu0 %239  ;;  %v282_v34 = vmul.f32 0.00390625, %v270_v59  ;;  %v380_v62 = vsel %vm325_vm4, %v379_v47, %v375_v56  ;;  %v752_v47 = vld [vmem:[#allocation2 + $0x238] sm:$0xff] }
  0xd1   : > { %v317_v43 = vrot.slane %v240_v63, %v316_v21  ;;  %v411_v21 = vsub.s32 1, %v1567_v57  ;;  %v1221_v50 = vpack.c.bf16 %v752_v47, %v750_v46  ;;  %v692_v56 = vld [vmem:[#allocation2 + $0x58] sm:$0xff]  ;;  %v766_v46 = vld [vmem:[#allocation2 + $0x2a8] sm:$0xff] }
  0xd2   : > { %v384_v51 = vrot.slane %v282_v34, %v330_v31  ;;  %v746_v34 = vld [vmem:[#allocation2 + $0x208] sm:$0xff]  ;;  %v768_v47 = vld [vmem:[#allocation2 + $0x2b8] sm:$0xff] }
  0xd3   : > { %v273_v16 = vpop.xlane.xlu1 %272  ;;  %v319_v58 = vsel %vm318_vm3, %v317_v43, %v312_v53  ;;  %v686_v43 = vld [vmem:[#allocation2 + $0x28] sm:$0xff] }
  0xd4   : > { %v243_v25 = vpop.xlane.xlu0 %242  ;;  %v283_v38 = vmul.f32 0.00390625, %v273_v16  ;;  %v385_v7 = vsel %vm332_vm5, %v384_v51, %v380_v62  ;;  %v685_v51 = vld [vmem:[#allocation2 + $0x20] sm:$0xff] }
  0xd5   : > { %v324_v49 = vrot.slane %v243_v25, %v323_v29  ;;  %v412_v25 = vrot.slane %v1596_v24, %v411_v21  ;;  %v689_v62 = vld [vmem:[#allocation2 + $0x40] sm:$0xff]  ;;  %v760_v21 = vld [vmem:[#allocation2 + $0x278] sm:$0xff] }
  0xd6   : > { %v389_v54 = vrot.slane %v283_v38, %v337_v35  ;;  %v683_v38 = vld [vmem:[#allocation2 + $0x10] sm:$0xff] }
  0xd7   : > { %v276_v40 = vpop.xlane.xlu1 %275  ;;  %v326_v63 = vsel %vm325_vm4, %v324_v49, %v319_v58 }
  0xd8   : > { %v246_v44 = vpop.xlane.xlu0 %245  ;;  %v284_v45 = vmul.f32 0.00390625, %v276_v40  ;;  %v390_v9 = vsel %vm339_vm6, %v389_v54, %v385_v7  ;;  %v1155_v40 = vpack.c.bf16 %v683_v38, %v681_v37  ;;  %v751_v54 = vld [vmem:[#allocation2 + $0x230] sm:$0xff]  ;;  %v753_v7 = vld [vmem:[#allocation2 + $0x240] sm:$0xff] }
  0xd9   : > { %v331_v48 = vrot.slane %v246_v44, %v330_v31  ;;  %v1219_v44 = vpack.c.bf16 %v747_v42, %v745_v41  ;;  %v1223_v58 = vpack.c.bf16 %v751_v54, %v749_v52  ;;  %v761_v41 = vld [vmem:[#allocation2 + $0x280] sm:$0xff]  ;;  %v703_v52 = vld [vmem:[#allocation2 + $0xb0] sm:$0xff]  ;;  %v1237_v54 = vpack.c.bf16 %v768_v47, %v766_v46  ;;  %v716_v46 = vld [vmem:[#allocation2 + $0x118] sm:$0xff] }
  0xda   : > { %v394_v59 = vrot.slane %v284_v45, %v344_v39  ;;  %v688_v45 = vld [vmem:[#allocation2 + $0x38] sm:$0xff] }
  0xdb   : > { %v252_v55 = vpop.xlane.xlu1 %251  ;;  %v333_v8 = vsel %vm332_vm5, %v331_v48, %v326_v63  ;;  %v1157_v49 = vpack.c.bf16 %v688_v45, %v686_v43  ;;  %v687_v48 = vld [vmem:[#allocation2 + $0x30] sm:$0xff]  ;;  %v704_v45 = vld [vmem:[#allocation2 + $0xb8] sm:$0xff] }
  0xdc   : > { %v249_v60 = vpop.xlane.xlu0 %248  ;;  %v345_v61 = vrot.slane %v252_v55, %v344_v39  ;;  %v395_v16 = vsel %vm346_vm7, %v394_v59, %v390_v9  ;;  %v1217_v39 = vpack.c.bf16 %v748_v36, %v746_v34  ;;  %v1159_v53 = vpack.c.bf16 %v687_v48, %v685_v51  ;;  %v690_v55 = vld [vmem:[#allocation2 + $0x48] sm:$0xff]  ;;  %v763_v43 = vld [vmem:[#allocation2 + $0x290] sm:$0xff]  ;;  %v701_v48 = vld [vmem:[#allocation2 + $0xa0] sm:$0xff] }
  0xdd   : > { %v338_v3 = vrot.slane %v249_v60, %v337_v35  ;;  %v1153_v35 = vpack.c.bf16 %v684_v33, %v682_v32  ;;  %v1161_v59 = vpack.c.bf16 %v692_v56, %v690_v55  ;;  %v754_v60 = vld [vmem:[#allocation2 + $0x248] sm:$0xff]  ;;  %v700_v33 = vld [vmem:[#allocation2 + $0x98] sm:$0xff]  ;;  %v767_v55 = vld [vmem:[#allocation2 + $0x2b0] sm:$0xff] }
  0xde   : > { %1218 = vmatprep.subr.bf16.mxu1 %v1217_v39  ;;  %v698_v32 = vld [vmem:[#allocation2 + $0x88] sm:$0xff]  ;;  %v697_v39 = vld [vmem:[#allocation2 + $0x80] sm:$0xff] }
  0xdf   : > { %v340_v12 = vsel %vm339_vm6, %v338_v3, %v333_v8  ;;  %1154 = vmatprep.subr.bf16.mxu0 %v1153_v35  ;;  %v691_v3 = vld [vmem:[#allocation2 + $0x50] sm:$0xff]  ;;  %v762_v34 = vld [vmem:[#allocation2 + $0x288] sm:$0xff]  ;;  %v764_v35 = vld [vmem:[#allocation2 + $0x298] sm:$0xff]  ;;  %v1169_v38 = vpack.c.bf16 %v700_v33, %v698_v32 }
  0xe0   : > { %v347_v13 = vsel %vm346_vm7, %v345_v61, %v340_v12  ;;  %v756_v61 = vld [vmem:[#allocation2 + $0x258] sm:$0xff]  ;;  %v755_v8 = vld [vmem:[#allocation2 + $0x250] sm:$0xff]  ;;  %v1163_v9 = vpack.c.bf16 %v691_v3, %v689_v62  ;;  %v694_v12 = vld [vmem:[#allocation2 + $0x68] sm:$0xff]  ;;  %v1233_v42 = vpack.c.bf16 %v764_v35, %v762_v34 }
  0xe1   : > { %v398_v17 = vsel %vm397_vm8, %v347_v13, %v395_v16  ;;  %v1225_v63 = vpack.c.bf16 %v756_v61, %v754_v60  ;;  %v696_v13 = vld [vmem:[#allocation2 + $0x78] sm:$0xff]  ;;  %v758_v16 = vld [vmem:[#allocation2 + $0x268] sm:$0xff]  ;;  %v1175_v61 = vpack.c.bf16 %v703_v52, %v701_v48  ;;  %v705_v3 = vld [vmem:[#allocation2 + $0xc0] sm:$0xff] }
  0xe2   : > { %1134 = vmatmul.mubr.msk.f32.vlgmr.msra.gmra.mrb[0].mxu0 %vm413_vm9, %v398_v17  ;;  %v1227_v17 = vpack.c.bf16 %v755_v8, %v753_v7  ;;  %v1165_v20 = vpack.c.bf16 %v696_v13, %v694_v12  ;;  %v706_v56 = vld [vmem:[#allocation2 + $0xc8] sm:$0xff]  ;;  %v772_v60 = vld [vmem:[#allocation2 + $0x2d8] sm:$0xff]  ;;  %v707_v7 = vld [vmem:[#allocation2 + $0xd0] sm:$0xff] }
  0xe3   : > { %1156 = vmatpush1.bf16.msra.mxu0 %v1155_v40  ;;  %v699_v40 = vld [vmem:[#allocation2 + $0x90] sm:$0xff]  ;;  %v769_v8 = vld [vmem:[#allocation2 + $0x2c0] sm:$0xff]  ;;  %v710_v13 = vld [vmem:[#allocation2 + $0xe8] sm:$0xff] }
  0xe4   : > { %1158 = vmatprep.subr.bf16.mxu0 %v1157_v49  ;;  %v1171_v49 = vpack.c.bf16 %v699_v40, %v697_v39  ;;  %v771_v12 = vld [vmem:[#allocation2 + $0x2d0] sm:$0xff]  ;;  %v709_v39 = vld [vmem:[#allocation2 + $0xe0] sm:$0xff] }
  0xe5   : > { %v711_v40 = vld [vmem:[#allocation2 + $0xf0] sm:$0xff] }
  0xe7   : > { %1160 = vmatpush1.bf16.msra.mxu0 %v1159_v53  ;;  %v765_v53 = vld [vmem:[#allocation2 + $0x2a0] sm:$0xff] }
  0xe8   : > { %1162 = vmatprep.subr.bf16.mxu0 %v1161_v59  ;;  %v770_v59 = vld [vmem:[#allocation2 + $0x2c8] sm:$0xff]  ;;  %v1239_v62 = vpack.c.bf16 %v767_v55, %v765_v53  ;;  %v777_v53 = vld [vmem:[#allocation2 + $0x300] sm:$0xff] }
  0xeb   : > { %1164 = vmatpush1.bf16.msra.mxu0 %v1163_v9  ;;  %v1241_v9 = vpack.c.bf16 %v772_v60, %v770_v59  ;;  %v782_v59 = vld [vmem:[#allocation2 + $0x328] sm:$0xff] }
  0xec   : > { %1166 = vmatprep.subr.bf16.mxu0 %v1165_v20  ;;  %v776_v20 = vld [vmem:[#allocation2 + $0x2f8] sm:$0xff] }
 0x1b5   : > { %v483_v28 = vpop.f32.mrb[0].mxu0 }
 0x1b6   : > { %v484_v29 = vadd.f32 %v483_v28, %v412_v25  ;;  %v1135_v30 = vpop.f32.mrb[1].mxu0  ;;  %v693_v25 = vld [vmem:[#allocation2 + $0x60] sm:$0xff]  ;;  %v695_v28 = vld [vmem:[#allocation2 + $0x70] sm:$0xff] }
 0x1b7   : > { %v757_v30 = vld [vmem:[#allocation2 + $0x260] sm:$0xff]  ;;  %v1167_v36 = vpack.c.bf16 %v695_v28, %v693_v25  ;;  %v1243_v25 = vpack.c.bf16 %v771_v12, %v769_v8 }
 0x1b8   : > { %v487_v31 = vmax.f32 %v484_v29, 0.0  ;;  %v1229_v29 = vpack.c.bf16 %v760_v21, %v758_v16  ;;  %v712_v16 = vld [vmem:[#allocation2 + $0xf8] sm:$0xff]  ;;  %v1179_v21 = vpack.c.bf16 %v707_v7, %v705_v3  ;;  %v719_v3 = vld [vmem:[#allocation2 + $0x130] sm:$0xff]  ;;  %v781_v7 = vld [vmem:[#allocation2 + $0x320] sm:$0xff] }
 0x1b9   : > { %1168 = vmatpush1.bf16.msra.mxu0 %v1167_v36  ;;  %v1181_v28 = vpack.c.bf16 %v712_v16, %v710_v13  ;;  %v722_v13 = vld [vmem:[#allocation2 + $0x148] sm:$0xff]  ;;  %v724_v16 = vld [vmem:[#allocation2 + $0x158] sm:$0xff] }
 0x1ba   : > { %1139 = vmatmul.mubr.msk.f32.vlgmr.msra.gmra.mrb[0].mxu1 %vm492_vm10, %v487_v31  ;;  %v759_v31 = vld [vmem:[#allocation2 + $0x270] sm:$0xff]  ;;  %1170 = vmatprep.subr.bf16.mxu0 %v1169_v38 }
 0x1bb   : > { %1220 = vmatpush1.bf16.msra.mxu1 %v1219_v44  ;;  %v1231_v37 = vpack.c.bf16 %v759_v31, %v757_v30  ;;  %v702_v44 = vld [vmem:[#allocation2 + $0xa8] sm:$0xff]  ;;  %v1600_v30 = vsub.s32 0, %v1567_v57 }
 0x1bc   : > { %1222 = vmatprep.subr.bf16.mxu1 %v1221_v50  ;;  %v1235_v50 = vpack.c.bf16 %v763_v43, %v761_v41  ;;  %v1173_v51 = vpack.c.bf16 %v704_v45, %v702_v44  ;;  %v773_v41 = vld [vmem:[#allocation2 + $0x2e0] sm:$0xff]  ;;  %v1183_v43 = vpack.c.bf16 %v711_v40, %v709_v39  ;;  %v775_v44 = vld [vmem:[#allocation2 + $0x2f0] sm:$0xff]  ;;  %v714_v57 = vld [vmem:[#allocation2 + $0x108] sm:$0xff] }
 0x1bd   : > { %1172 = vmatpush1.bf16.msra.mxu0 %v1171_v49  ;;  %v491_v31 = vrot.slane %v1596_v24, %v1600_v30  ;;  %v1247_v45 = vpack.c.bf16 %v775_v44, %v773_v41  ;;  %v778_v24 = vld [vmem:[#allocation2 + $0x308] sm:$0xff]  ;;  %v1185_v47 = vpack.c.bf16 %v716_v46, %v714_v57  ;;  %v780_v49 = vld [vmem:[#allocation2 + $0x318] sm:$0xff]  ;;  %v789_v57 = vld [vmem:[#allocation2 + $0x360] sm:$0xff] }
 0x1be   : > { %1174 = vmatprep.subr.bf16.mxu0 %v1173_v51  ;;  %v715_v51 = vld [vmem:[#allocation2 + $0x110] sm:$0xff]  ;;  %v1249_v48 = vpack.c.bf16 %v780_v49, %v778_v24  ;;  %v790_v39 = vld [vmem:[#allocation2 + $0x368] sm:$0xff]  ;;  %v792_v41 = vld [vmem:[#allocation2 + $0x378] sm:$0xff] }
 0x1bf   : > { %1224 = vmatpush1.bf16.msra.mxu1 %v1223_v58  ;;  %v708_v58 = vld [vmem:[#allocation2 + $0xd8] sm:$0xff]  ;;  %v1261_v44 = vpack.c.bf16 %v792_v41, %v790_v39  ;;  %v791_v46 = vld [vmem:[#allocation2 + $0x370] sm:$0xff]  ;;  %v806_v41 = vld [vmem:[#allocation2 + $0x3e8] sm:$0xff] }
 0x1c0   : > { %1226 = vmatprep.subr.bf16.mxu1 %v1225_v63  ;;  %v1177_v63 = vpack.c.bf16 %v708_v58, %v706_v56  ;;  %v718_v56 = vld [vmem:[#allocation2 + $0x128] sm:$0xff]  ;;  %v720_v58 = vld [vmem:[#allocation2 + $0x138] sm:$0xff]  ;;  %v1263_v24 = vpack.c.bf16 %v791_v46, %v789_v57  ;;  %v743_v57 = vld [vmem:[#allocation2 + $0x1f0] sm:$0xff] }
 0x1c1   : > { %1176 = vmatpush1.bf16.msra.mxu0 %v1175_v61  ;;  %v1189_v60 = vpack.c.bf16 %v720_v58, %v718_v56  ;;  %v784_v61 = vld [vmem:[#allocation2 + $0x338] sm:$0xff]  ;;  %v793_v56 = vld [vmem:[#allocation2 + $0x380] sm:$0xff]  ;;  %v795_v58 = vld [vmem:[#allocation2 + $0x390] sm:$0xff] }
 0x1c2   : > { %1178 = vmatprep.subr.bf16.mxu0 %v1177_v63  ;;  %v717_v63 = vld [vmem:[#allocation2 + $0x120] sm:$0xff]  ;;  %v732_v49 = vld [vmem:[#allocation2 + $0x198] sm:$0xff] }
 0x1c3   : > { %1228 = vmatpush1.bf16.msra.mxu1 %v1227_v17  ;;  %v774_v17 = vld [vmem:[#allocation2 + $0x2e8] sm:$0xff]  ;;  %v1191_v8 = vpack.c.bf16 %v719_v3, %v717_v63  ;;  %v800_v3 = vld [vmem:[#allocation2 + $0x3b8] sm:$0xff]  ;;  %v805_v46 = vld [vmem:[#allocation2 + $0x3e0] sm:$0xff] }
 0x1c4   : > { %1230 = vmatprep.subr.bf16.mxu1 %v1229_v29  ;;  %v1245_v29 = vpack.c.bf16 %v776_v20, %v774_v17  ;;  %v786_v17 = vld [vmem:[#allocation2 + $0x348] sm:$0xff] }
 0x1c5   : > { %1180 = vmatpush1.bf16.msra.mxu0 %v1179_v21  ;;  %v1193_v21 = vpack.c.bf16 %v724_v16, %v722_v13  ;;  %v797_v13 = vld [vmem:[#allocation2 + $0x3a0] sm:$0xff]  ;;  %v799_v16 = vld [vmem:[#allocation2 + $0x3b0] sm:$0xff] }
 0x1c6   : > { %1182 = vmatprep.subr.bf16.mxu0 %v1181_v28  ;;  %v721_v28 = vld [vmem:[#allocation2 + $0x140] sm:$0xff] }
 0x1c7   : > { %1232 = vmatpush1.bf16.msra.mxu1 %v1231_v37 }
 0x1c8   : > { %1234 = vmatprep.subr.bf16.mxu1 %v1233_v42 }
 0x1c9   : > { %1184 = vmatpush1.bf16.msra.mxu0 %v1183_v43  ;;  %v727_v43 = vld [vmem:[#allocation2 + $0x170] sm:$0xff] }
 0x1ca   : > { %1186 = vmatprep.subr.bf16.mxu0 %v1185_v47  ;;  %v730_v47 = vld [vmem:[#allocation2 + $0x188] sm:$0xff] }
 0x1cb   : > { %1236 = vmatpush1.bf16.msra.mxu1 %v1235_v50  ;;  %v713_v50 = vld [vmem:[#allocation2 + $0x100] sm:$0xff] }
 0x1cc   : > { %1238 = vmatprep.subr.bf16.mxu1 %v1237_v54  ;;  %v1187_v52 = vpack.c.bf16 %v715_v51, %v713_v50  ;;  %v779_v54 = vld [vmem:[#allocation2 + $0x310] sm:$0xff]  ;;  %v794_v50 = vld [vmem:[#allocation2 + $0x388] sm:$0xff]  ;;  %v1201_v51 = vpack.c.bf16 %v732_v49, %v730_v47 }
 0x1cd   : > { %v1251_v55 = vpack.c.bf16 %v779_v54, %v777_v53  ;;  %v731_v53 = vld [vmem:[#allocation2 + $0x190] sm:$0xff] }
 0x1ce   : > { %1188 = vmatpush1.bf16.msra.mxu0 %v1187_v52  ;;  %v729_v52 = vld [vmem:[#allocation2 + $0x180] sm:$0xff]  ;;  %v807_v47 = vld [vmem:[#allocation2 + $0x3f0] sm:$0xff] }
 0x1cf   : > { %1240 = vmatpush1.bf16.msra.mxu1 %v1239_v62  ;;  %v1253_v62 = vpack.c.bf16 %v784_v61, %v782_v59  ;;  %1190 = vmatprep.subr.bf16.mxu0 %v1189_v60  ;;  %v1267_v59 = vpack.c.bf16 %v795_v58, %v793_v56  ;;  %v734_v60 = vld [vmem:[#allocation2 + $0x1a8] sm:$0xff]  ;;  %v736_v61 = vld [vmem:[#allocation2 + $0x1b8] sm:$0xff]  ;;  %v1279_v49 = vpack.c.bf16 %v807_v47, %v805_v46 }
 0x1d0   : > { %1242 = vmatprep.subr.bf16.mxu1 %v1241_v9  ;;  %v783_v9 = vld [vmem:[#allocation2 + $0x330] sm:$0xff]  ;;  %v1205_v63 = vpack.c.bf16 %v736_v61, %v734_v60 }
 0x1d1   : > { %v1255_v12 = vpack.c.bf16 %v783_v9, %v781_v7  ;;  %v733_v7 = vld [vmem:[#allocation2 + $0x1a0] sm:$0xff] }
 0x1d2   : > { %1192 = vmatpush1.bf16.msra.mxu0 %v1191_v8  ;;  %v735_v8 = vld [vmem:[#allocation2 + $0x1b0] sm:$0xff] }
 0x1d3   : > { %1244 = vmatpush1.bf16.msra.mxu1 %v1243_v25  ;;  %v788_v25 = vld [vmem:[#allocation2 + $0x358] sm:$0xff]  ;;  %1194 = vmatprep.subr.bf16.mxu0 %v1193_v21 }
 0x1d4   : > { %1246 = vmatprep.subr.bf16.mxu1 %v1245_v29  ;;  %v723_v29 = vld [vmem:[#allocation2 + $0x150] sm:$0xff]  ;;  %v740_v21 = vld [vmem:[#allocation2 + $0x1d8] sm:$0xff] }
 0x1d7   : > { %1248 = vmatpush1.bf16.msra.mxu1 %v1247_v45 }
 0x1d8   : > { %1250 = vmatprep.subr.bf16.mxu1 %v1249_v48  ;;  %v796_v48 = vld [vmem:[#allocation2 + $0x398] sm:$0xff] }
 0x1d9   : > { %v1265_v54 = vpack.c.bf16 %v796_v48, %v794_v50 }
 0x1db   : > { %1252 = vmatpush1.bf16.msra.mxu1 %v1251_v55  ;;  %v1203_v55 = vpack.c.bf16 %v731_v53, %v729_v52 }
 0x1dc   : > { %1254 = vmatprep.subr.bf16.mxu1 %v1253_v62  ;;  %v798_v62 = vld [vmem:[#allocation2 + $0x3a8] sm:$0xff] }
 0x1dd   : > { %v1269_v9 = vpack.c.bf16 %v800_v3, %v798_v62 }
 0x1df   : > { %1256 = vmatpush1.bf16.msra.mxu1 %v1255_v12  ;;  %v1207_v12 = vpack.c.bf16 %v735_v8, %v733_v7 }
 0x28d   : > { %v562_v32 = vpop.f32.mrb[0].mxu1 }
 0x28e   : > { %v563_v33 = vadd.f32 %v562_v32, %v491_v31  ;;  %v1140_v34 = vpop.f32.mrb[1].mxu1  ;;  %v1257_v32 = vpack.c.bf16 %v788_v25, %v786_v17  ;;  %v1271_v17 = vpack.c.bf16 %v799_v16, %v797_v13  ;;  %v802_v25 = vld [vmem:[#allocation2 + $0x3c8] sm:$0xff] }
 0x28f   : > { %v785_v34 = vld [vmem:[#allocation2 + $0x340] sm:$0xff] }
 0x290   : > { %v567_v35 = vrot.slane %v563_v33, 1  ;;  %1258 = vmatprep.subr.bf16.mxu1 %v1257_v32  ;;  %v737_v32 = vld [vmem:[#allocation2 + $0x1c0] sm:$0xff] }
 0x292   : > { %v569_v36 = vadd.f32 %v567_v35, %v563_v33  ;;  %v1195_v33 = vpack.c.bf16 %v723_v29, %v721_v28  ;;  %v787_v35 = vld [vmem:[#allocation2 + $0x350] sm:$0xff]  ;;  %v804_v29 = vld [vmem:[#allocation2 + $0x3d8] sm:$0xff] }
 0x294   : > { %v1099_v37 = vmul.f32 -1.442695, %v569_v36  ;;  %v1259_v36 = vpack.c.bf16 %v787_v35, %v785_v34  ;;  %1196 = vmatpush1.bf16.msra.mxu0 %v1195_v33  ;;  %v739_v33 = vld [vmem:[#allocation2 + $0x1d0] sm:$0xff]  ;;  %v1273_v34 = vpack.c.bf16 %v804_v29, %v802_v25 }
 0x295   : > { %v1211_v35 = vpack.c.bf16 %v739_v33, %v737_v32 }
 0x296   : > { %1307 = vpow2.f32 %v1099_v37  ;;  %v726_v37 = vld [vmem:[#allocation2 + $0x168] sm:$0xff]  ;;  %1260 = vmatpush1.bf16.msra.mxu1 %v1259_v36  ;;  %v801_v36 = vld [vmem:[#allocation2 + $0x3c0] sm:$0xff] }
 0x297   : > { %1262 = vmatprep.subr.bf16.mxu1 %v1261_v44 }
 0x29a   : > { %1264 = vmatpush1.bf16.msra.mxu1 %v1263_v24 }
 0x29b   : > { %1266 = vmatprep.subr.bf16.mxu1 %v1265_v54 }
 0x29e   : > { %1268 = vmatpush1.bf16.msra.mxu1 %v1267_v59 }
 0x29f   : > { %1270 = vmatprep.subr.bf16.mxu1 %v1269_v9 }
 0x2a0   : > { %v1308_v38 = vpop.eup %1307 }
 0x2a1   : > { %v573_v42 = vadd.f32 1.0, %v1308_v38  ;;  %v728_v38 = vld [vmem:[#allocation2 + $0x178] sm:$0xff] }
 0x2a2   : > { %v1197_v40 = vpack.c.bf16 %v728_v38, %v726_v37  ;;  %1272 = vmatpush1.bf16.msra.mxu1 %v1271_v17  ;;  %v803_v37 = vld [vmem:[#allocation2 + $0x3d0] sm:$0xff]  ;;  %v742_v38 = vld [vmem:[#allocation2 + $0x1e8] sm:$0xff] }
 0x2a3   : > { %1309 = vrcp.f32 %v573_v42  ;;  %v725_v42 = vld [vmem:[#allocation2 + $0x160] sm:$0xff]  ;;  %v1275_v39 = vpack.c.bf16 %v803_v37, %v801_v36  ;;  %1274 = vmatprep.subr.bf16.mxu1 %v1273_v34 }
 0x2a4   : > { %v1199_v45 = vpack.c.bf16 %v727_v43, %v725_v42  ;;  %1198 = vmatprep.subr.bf16.mxu0 %v1197_v40  ;;  %v744_v40 = vld [vmem:[#allocation2 + $0x1f8] sm:$0xff] }
 0x2a5   : > { %v808_v42 = vld [vmem:[#allocation2 + $0x3f8] sm:$0xff]  ;;  %v1213_v43 = vpack.c.bf16 %v744_v40, %v742_v38 }
 0x2a6   : > { %1200 = vmatpush1.bf16.msra.mxu0 %v1199_v45  ;;  %v1277_v44 = vpack.c.bf16 %v808_v42, %v806_v41  ;;  %v741_v45 = vld [vmem:[#allocation2 + $0x1e0] sm:$0xff]  ;;  %1276 = vmatpush1.bf16.msra.mxu1 %v1275_v39 }
 0x2a7   : > { %1202 = vmatprep.subr.bf16.mxu0 %v1201_v51  ;;  %v1215_v24 = vpack.c.bf16 %v743_v57, %v741_v45 }
 0x2a8   : > { %1278 = vmatprep.subr.bf16.mxu1 %v1277_v44 }
 0x2aa   : > { %1204 = vmatpush1.bf16.msra.mxu0 %v1203_v55  ;;  %1280 = vmatpush1.bf16.msra.mxu1 %v1279_v49 }
 0x2ab   : > { %1206 = vmatprep.subr.bf16.mxu0 %v1205_v63 }
 0x2ad   : > { %v1310_v20 = vpop.eup %1309 }
 0x2ae   : > { %v1605_v31 = vrot.slane %v1310_v20, %v1600_v30  ;;  %v738_v20 = vld [vmem:[#allocation2 + $0x1c8] sm:$0xff]  ;;  %1208 = vmatpush1.bf16.msra.mxu0 %v1207_v12 }
 0x2af   : > { %v1209_v28 = vpack.c.bf16 %v740_v21, %v738_v20 }
 0x2b0   : > { %585 = vbcast.lane.b32.xlu1 %v1605_v31, 264  ;;  %581 = vbcast.lane.b32.xlu0 %v1605_v31, 256 }
 0x2b1   : > { %1210 = vmatprep.subr.bf16.mxu0 %v1209_v28 }
 0x2b2   : > { %1212 = vmatpush1.bf16.msra.mxu0 %v1211_v35 }
 0x2b3   : > { %1214 = vmatprep.subr.bf16.mxu0 %v1213_v43 }
 0x2b4   : > { %589 = vbcast.lane.b32.xlu1 %v1605_v31, 272  ;;  %597 = vbcast.lane.b32.xlu0 %v1605_v31, 288 }
 0x2b6   : > { %1216 = vmatpush1.bf16.msra.mxu0 %v1215_v24 }
 0x2b8   : > { %593 = vbcast.lane.b32.xlu1 %v1605_v31, 280  ;;  %605 = vbcast.lane.b32.xlu0 %v1605_v31, 304 }
 0x2bc   : > { %601 = vbcast.lane.b32.xlu1 %v1605_v31, 296 }
 0x2c0   : > { %609 = vbcast.lane.b32.xlu1 %v1605_v31, 312 }
 0x322   : > { %v586_v50 = vpop.permute.xlu1 %585  ;;  %v582_v51 = vpop.permute.xlu0 %581 }
 0x323   : > { %v1616_v48 = vmul.f32 %v586_v50, %v1478_v5  ;;  %v1619_v31 = vmul.f32 %v586_v50, %v1481_v6  ;;  %v1622_v52 = vmul.f32 %v582_v51, %v1470_v2  ;;  %v1625_v53 = vmul.f32 %v582_v51, %v1475_v4 }
 0x325   : > { %v653_v5 = vadd.f32 %v1616_v48, %v1622_v52  ;;  %v666_v6 = vadd.f32 %v1619_v31, %v1625_v53 }
 0x326   : > { %v590_v54 = vpop.permute.xlu1 %589  ;;  %v598_v58 = vpop.permute.xlu0 %597 }
 0x327   : > { %v1628_v55 = vmul.f32 %v590_v54, %v1464_v0  ;;  %v1631_v56 = vmul.f32 %v590_v54, %v1467_v1  ;;  %v1650_v62 = vmul.f32 %v598_v58, %v1500_v14  ;;  %v1653_v63 = vmul.f32 %v598_v58, %v1503_v15 }
 0x329   : > { %v627_v2 = vmax.f32 %v1622_v52, %v1628_v55  ;;  %v640_v4 = vmax.f32 %v1625_v53, %v1631_v56  ;;  %v654_v0 = vadd.f32 %v653_v5, %v1628_v55  ;;  %v667_v60 = vadd.f32 %v666_v6, %v1631_v56 }
 0x32a   : > { %v594_v59 = vpop.permute.xlu1 %593  ;;  %v606_v8 = vpop.permute.xlu0 %605 }
 0x32b   : > { %v1644_v1 = vmul.f32 %v594_v59, %v1490_v10  ;;  %v1647_v61 = vmul.f32 %v594_v59, %v1493_v11  ;;  %v629_v9 = vmax.f32 %v627_v2, %v1650_v62  ;;  %v642_v12 = vmax.f32 %v640_v4, %v1653_v63 }
 0x32c   : > { %v1672_v20 = vmul.f32 %v606_v8, %v1520_v22  ;;  %v1675_v21 = vmul.f32 %v606_v8, %v1523_v23 }
 0x32d   : > { %v655_v3 = vadd.f32 %v654_v0, %v1644_v1  ;;  %v668_v7 = vadd.f32 %v667_v60, %v1647_v61  ;;  %v628_v16 = vmax.f32 %v1616_v48, %v1644_v1  ;;  %v641_v17 = vmax.f32 %v1619_v31, %v1647_v61 }
 0x32e   : > { %v602_v10 = vpop.permute.xlu1 %601  ;;  %v631_v34 = vmax.f32 %v629_v9, %v1672_v20  ;;  %v644_v35 = vmax.f32 %v642_v12, %v1675_v21 }
 0x32f   : > { %v1660_v13 = vmul.f32 %v602_v10, %v1510_v18  ;;  %v1663_v11 = vmul.f32 %v602_v10, %v1513_v19  ;;  %v656_v14 = vadd.f32 %v655_v3, %v1650_v62  ;;  %v669_v15 = vadd.f32 %v668_v7, %v1653_v63 }
 0x331   : > { %v657_v18 = vadd.f32 %v656_v14, %v1660_v13  ;;  %v670_v19 = vadd.f32 %v669_v15, %v1663_v11  ;;  %v630_v25 = vmax.f32 %v628_v16, %v1660_v13  ;;  %v643_v28 = vmax.f32 %v641_v17, %v1663_v11 }
 0x332   : > { %v610_v29 = vpop.permute.xlu1 %609 }
 0x333   : > { %v1682_v32 = vmul.f32 %v610_v29, %v1530_v26  ;;  %v1685_v33 = vmul.f32 %v610_v29, %v1533_v27  ;;  %v658_v22 = vadd.f32 %v657_v18, %v1672_v20  ;;  %v671_v23 = vadd.f32 %v670_v19, %v1675_v21 }
 0x335   : > { %v632_v36 = vmax.f32 %v630_v25, %v1682_v32  ;;  %v645_v37 = vmax.f32 %v643_v28, %v1685_v33  ;;  %v659_v38 = vadd.f32 %v658_v22, %v1682_v32  ;;  %v672_v26 = vadd.f32 %v671_v23, %v1685_v33 }
 0x337   : > { %v633_v39 = vmax.f32 %v631_v34, %v632_v36  ;;  %v646_v40 = vmax.f32 %v644_v35, %v645_v37  ;;  %v660_v27 = vrot.slane %v659_v38, 4  ;;  %v673_v41 = vrot.slane %v672_v26, 4 }
 0x339   : > { %v634_v42 = vrot.slane %v633_v39, 4  ;;  %v647_v43 = vrot.slane %v646_v40, 4  ;;  %v661_v44 = vadd.f32 %v660_v27, %v659_v38  ;;  %v674_v45 = vadd.f32 %v673_v41, %v672_v26  ;;  %v1320_v27 = vld [vmem:[%s1461_s10 + $0x10] sm:$0xff] }
 0x33b   : > { %v635_v57 = vmax.f32 %v633_v39, %v634_v42  ;;  %v662_v46 = vrot.slane %v661_v44, 2  ;;  %v648_v24 = vmax.f32 %v646_v40, %v647_v43  ;;  %v675_v47 = vrot.slane %v674_v45, 2  ;;  %v1321_v42 = vld [vmem:[%s1461_s10 + $0x20] sm:$0xff] }
 0x33d   : > { %v636_v49 = vrot.slane %v635_v57, 2  ;;  %v663_v50 = vadd.f32 %v662_v46, %v661_v44  ;;  %v649_v51 = vrot.slane %v648_v24, 2  ;;  %v676_v54 = vadd.f32 %v675_v47, %v674_v45  ;;  %v1322_v44 = vld [vmem:[%s1461_s10 + $0x30] sm:$0xff]  ;;  %v1323_v45 = vld [vmem:[%s1461_s10 + $0x40] sm:$0xff] }
 0x33f   : > { %v650_v58 = vmax.f32 %v648_v24, %v649_v51  ;;  %v677_v5 = vrot.slane %v676_v54, 1  ;;  %v637_v6 = vmax.f32 %v635_v57, %v636_v49  ;;  %v664_v2 = vrot.slane %v663_v50, 1  ;;  %v1326_v24 = vld [vmem:[%s1461_s10 + $0x70] sm:$0xff] }
 0x341   : > { %v651_v4 = vrot.slane %v650_v58, 1  ;;  %v678_v59 = vadd.f32 %v677_v5, %v676_v54  ;;  %v638_v0 = vrot.slane %v637_v6, 1  ;;  %v665_v60 = vadd.f32 %v664_v2, %v663_v50 }
 0x343   : > { %v652_v3 = vmax.f32 %v650_v58, %v651_v4  ;;  %v680_v7 = vmul.f32 0.015625, %v678_v59  ;;  %v639_v8 = vmax.f32 %v637_v6, %v638_v0  ;;  %v679_v9 = vmul.f32 0.015625, %v665_v60  ;;  %v1329_v4 = vld [vmem:[%s1461_s10 + $0x28] sm:$0xff]  ;;  %v1332_v60 = vld [vmem:[%s1461_s10 + $0x58] sm:$0xff] }
 0x345   : > { %873 = vmatprep.mubr.f32.mxu0 %v652_v3  ;;  %944 = vmatprep.mubr.f32.mxu1 %v680_v7  ;;  %v1333_v3 = vld [vmem:[%s1461_s10 + $0x68] sm:$0xff] }
 0x346   : > { %874 = vmatmul.mubr.f32.vlgmr.msra.gmra.mrb[2].mxu0 %v639_v8  ;;  %945 = vmatmul.mubr.f32.vlgmr.msra.gmra.mrb[2].mxu1 %v679_v9  ;;  %v1334_v8 = vld [vmem:[%s1461_s10 + $0x78] sm:$0xff] }
 0x419   : > { %v875_v12 = vpop.f32.mrb[2].mxu0  ;;  %v946_v10 = vpop.f32.mrb[2].mxu1 }
 0x41a   : > { %v947_v14 = vadd.f32 %v946_v10, %v875_v12  ;;  %v877_v15 = vpop.f32.mrb[3].mxu0  ;;  %v948_v16 = vpop.f32.mrb[3].mxu1 }
 0x41b   : > { %v949_v17 = vadd.f32 %v948_v16, %v877_v15 }
 0x41c   : > { %v1100_v18 = vmul.f32 -1.442695, %v947_v14 }
 0x41d   : > { %v1101_v19 = vmul.f32 -1.442695, %v949_v17 }
 0x41e   : > { %1311 = vpow2.f32 %v1100_v18 }
 0x41f   : > { %1313 = vpow2.f32 %v1101_v19 }
 0x428   : > { %v1312_v25 = vpop.eup %1311 }
 0x429   : > { %v1314_v28 = vpop.eup %1313  ;;  %v957_v29 = vadd.f32 1.0, %v1312_v25 }
 0x42a   : > { %v958_v22 = vadd.f32 1.0, %v1314_v28 }
 0x42b   : > { %1315 = vrcp.f32 %v957_v29 }
 0x42c   : > { %1317 = vrcp.f32 %v958_v22 }
 0x435   : > { %v1316_v23 = vpop.eup %1315 }
 0x436   : > { %v1318_v34 = vpop.eup %1317  ;;  %v966_v35 = vrot.slane %v1316_v23, %v1600_v30 }
 0x437   : > { %v970_v36 = vrot.slane %v1318_v34, %v1600_v30 }
 0x438   : > { %v971_v37 = vmul.f32 %v966_v35, %v1622_v52  ;;  %v973_v38 = vmul.f32 %v966_v35, %v1616_v48  ;;  %v975_v26 = vmul.f32 %v966_v35, %v1628_v55  ;;  %v977_v39 = vmul.f32 %v966_v35, %v1644_v1  ;;  %v1319_v55 = vld [vmem:[%s1461_s10] sm:$0xff] }
 0x439   : > { %v979_v40 = vmul.f32 %v966_v35, %v1650_v62  ;;  %v981_v30 = vmul.f32 %v966_v35, %v1660_v13  ;;  %v983_v52 = vmul.f32 %v966_v35, %v1672_v20  ;;  %v985_v48 = vmul.f32 %v966_v35, %v1682_v32  ;;  %v1324_v20 = vld [vmem:[%s1461_s10 + $0x50] sm:$0xff]  ;;  %v1325_v32 = vld [vmem:[%s1461_s10 + $0x60] sm:$0xff] }
 0x43a   : > { %v987_v1 = vadd.f32 %v1319_v55, %v971_v37  ;;  %v989_v41 = vadd.f32 %v1320_v27, %v973_v38  ;;  %v991_v43 = vadd.f32 %v1321_v42, %v975_v26  ;;  %v993_v62 = vadd.f32 %v1322_v44, %v977_v39 }
 0x43b   : > { %v995_v13 = vadd.f32 %v1323_v45, %v979_v40  ;;  %v997_v57 = vadd.f32 %v1324_v20, %v981_v30  ;;  %v999_v46 = vadd.f32 %v1325_v32, %v983_v52  ;;  %v1001_v47 = vadd.f32 %v1326_v24, %v985_v48 }
 0x43c   : > { %1003 = vst [vmem:[%s1706_s11] sm:$0xff] %v987_v1  ;;  %1005 = vst [vmem:[%s1706_s11 + $0x10] sm:$0xff] %v989_v41  ;;  %v972_v49 = vmul.f32 %v970_v36, %v1625_v53  ;;  %v974_v50 = vmul.f32 %v970_v36, %v1619_v31  ;;  %v976_v51 = vmul.f32 %v970_v36, %v1631_v56  ;;  %v1327_v56 = vld [vmem:[%s1461_s10 + $0x8] sm:$0xff] }
 0x43d   : > { %1007 = vst [vmem:[%s1706_s11 + $0x20] sm:$0xff] %v991_v43  ;;  %1009 = vst [vmem:[%s1706_s11 + $0x30] sm:$0xff] %v993_v62  ;;  %v978_v54 = vmul.f32 %v970_v36, %v1647_v61  ;;  %v980_v58 = vmul.f32 %v970_v36, %v1653_v63  ;;  %v982_v5 = vmul.f32 %v970_v36, %v1663_v11  ;;  %v1328_v61 = vld [vmem:[%s1461_s10 + $0x18] sm:$0xff] }
 0x43e   : > { %1011 = vst [vmem:[%s1706_s11 + $0x40] sm:$0xff] %v995_v13  ;;  %1013 = vst [vmem:[%s1706_s11 + $0x50] sm:$0xff] %v997_v57  ;;  %v984_v53 = vmul.f32 %v970_v36, %v1675_v21  ;;  %v986_v31 = vmul.f32 %v970_v36, %v1685_v33  ;;  %v988_v6 = vadd.f32 %v1327_v56, %v972_v49  ;;  %v1330_v63 = vld [vmem:[%s1461_s10 + $0x38] sm:$0xff]  ;;  %v1331_v21 = vld [vmem:[%s1461_s10 + $0x48] sm:$0xff] }
 0x43f   : > { %1015 = vst [vmem:[%s1706_s11 + $0x60] sm:$0xff] %v999_v46  ;;  %1017 = vst [vmem:[%s1706_s11 + $0x70] sm:$0xff] %v1001_v47  ;;  %v990_v2 = vadd.f32 %v1328_v61, %v974_v50  ;;  %v992_v59 = vadd.f32 %v1329_v4, %v976_v51  ;;  %v994_v11 = vadd.f32 %v1330_v63, %v978_v54 }
 0x440   : > { %v996_v0 = vadd.f32 %v1331_v21, %v980_v58  ;;  %v998_v33 = vadd.f32 %v1332_v60, %v982_v5  ;;  %v1000_v7 = vadd.f32 %v1333_v3, %v984_v53  ;;  %v1002_v9 = vadd.f32 %v1334_v8, %v986_v31  ;;  %1004 = vst [vmem:[%s1706_s11 + $0x8] sm:$0xff] %v988_v6 }
 0x441   : > { %1006 = vst [vmem:[%s1706_s11 + $0x18] sm:$0xff] %v990_v2  ;;  %1008 = vst [vmem:[%s1706_s11 + $0x28] sm:$0xff] %v992_v59 }
 0x442   : > { %1010 = vst [vmem:[%s1706_s11 + $0x38] sm:$0xff] %v994_v11  ;;  %1012 = vst [vmem:[%s1706_s11 + $0x48] sm:$0xff] %v996_v0 }
 0x443   : > { %1014 = vst [vmem:[%s1706_s11 + $0x58] sm:$0xff] %v998_v33  ;;  %1016 = vst [vmem:[%s1706_s11 + $0x68] sm:$0xff] %v1000_v7 }
 0x444   : > { %1018 = vst [vmem:[%s1706_s11 + $0x78] sm:$0xff] %v1002_v9 }
 0x445 PF: > { %s15_s15 = sadd.s32 1, %s1373_s15  }
 0x446   : > { %p12_p3 = scmp.ge.s32.totalorder %s15_s15, 4  }
 0x448   :  { %14 = sbr.rel (!%p12_p3) target bundleno = 1 (0x1), region = 71 }
 0x44f   :  { %1040 = vsyncpa [#allocation3], 1 }
 0x450   :  { %1042 = vsyncpa [#allocation3 + $0x1], 1 }

</bundles_post_ra>
